<compile_context>
chip_gen: v6e
topology: v6e:2x2x1
jax: 0.10.0
libtpu: 0.0.40
codegen_flags: <defaults>
</compile_context>

<pallas_src>
import functools

import numpy as np
import jax
import jax.numpy as jnp
from jax.experimental import pallas as pl
from jax.experimental.pallas import tpu as pltpu


# ----------------------------------------------------------------------------
# Exact (erf-based) GELU built only from ops with guaranteed Mosaic lowerings.
# TODO(synk): switch to lax.erf once its Pallas/Mosaic lowering is confirmed; this
# Abramowitz&Stegun 7.1.26 rational approximation has |err| <= 1.5e-7 (vs true erf).
# TODO(synk): on v5e, move the divide to the EUP via pl.reciprocal(..., approx=True)
# once its accuracy vs the 5e-3 matched-reference check is characterised.
# ----------------------------------------------------------------------------
_ERF_P = 0.3275911
_ERF_A1 = 0.254829592
_ERF_A2 = -0.284496736
_ERF_A3 = 1.421413741
_ERF_A4 = -1.453152027
_ERF_A5 = 1.061405429
_INV_SQRT2 = float(1.0 / np.sqrt(2.0))


def _erf_approx(z):
    za = jnp.abs(z)
    t = 1.0 / (1.0 + _ERF_P * za)
    poly = ((((_ERF_A5 * t + _ERF_A4) * t + _ERF_A3) * t + _ERF_A2) * t + _ERF_A1) * t
    y = 1.0 - poly * jnp.exp(-za * za)
    return jnp.where(z < 0.0, -y, y)


def _gelu_exact(x):
    # nn.GELU() (exact, erf-based) -- VPU/EUP work, effectively free next to the matmuls.
    return 0.5 * x * (1.0 + _erf_approx(x * _INV_SQRT2))


# ----------------------------------------------------------------------------
# Pallas kernel: fused Inception_Block_V1 -> GELU -> Inception_Block_V1
# ----------------------------------------------------------------------------
def _make_fused_kernel(TB, H, W, cin, chid, cout, P):
    Hp = H + 2 * P          # height-padded rows per image
    D = 2 * P + 1           # number of banded matmuls per conv
    L = TB * Hp - 2 * P     # batch-stacked matmul M dimension (covers all TB images)

    def kernel(x_ref, w1_ref, b1_ref, w2_ref, b2_ref, out_ref,
               xpad_ref, hpad_ref, acc1_ref, acc2_ref):
        # x_ref   : (TB, H, W*cin)       bf16  one period-row per (tb,h) row, lanes=(w,ci)
        # w1_ref  : (D, W*cin, W*chid)   bf16  width-banded conv1 weights (1/nk pre-scaled)
        # b1_ref  : (1, W*chid)          f32   conv1 mean bias tiled over w
        # w2_ref  : (D, W*chid, W*cout)  bf16  width-banded conv2 weights
        # b2_ref  : (1, W*cout)          f32
        # out_ref : (TB, H, W*cout)      f32
        # xpad_ref: VMEM (TB*Hp, W*cin)  bf16  flat height-padded input (zero halos)
        # hpad_ref: VMEM (TB*Hp, W*chid) bf16  flat height-padded GELU intermediate
        # acc1_ref: VMEM (L, W*chid)     f32   conv1 accumulator
        # acc2_ref: VMEM (L, W*cout)     f32   conv2 accumulator

        if P > 0:
            zx = jnp.zeros((P, W * cin), xpad_ref.dtype)
            zh = jnp.zeros((P, W * chid), hpad_ref.dtype)
        for tb in range(TB):                           # static unroll, TB is small
            base = tb * Hp
            if P > 0:
                # Zero ONLY the 2P halo rows per image; the interior is fully overwritten
                # below.  Done every step (cheap) rather than gated on program_id==0: with a
                # "parallel" grid axis the scratch is per-core and the second TensorCore on
                # v7x would otherwise never initialise its halos.
                xpad_ref[base:base + P, :] = zx
                xpad_ref[base + P + H:base + Hp, :] = zx
                hpad_ref[base:base + P, :] = zh
                hpad_ref[base + P + H:base + Hp, :] = zh
            xpad_ref[base + P:base + P + H, :] = x_ref[tb]
            # TODO(synk): for large inputs, DMA HBM directly into the xpad interior
            # (memory_space=pl.ANY + make_async_copy) to skip this VMEM->VMEM staging pass.

        b1 = b1_ref[...]
        b2 = b2_ref[...]

        # --- Inception block 1: D banded matmuls, M = L (all TB images at once), ----------
        #     K = W*cin, N = W*chid, accumulated in an f32 VMEM scratch ref.
        acc1_ref[...] = jnp.dot(xpad_ref[0:L, :], w1_ref[0],
                                preferred_element_type=jnp.float32)
        for d in range(1, D):
            acc1_ref[...] += jnp.dot(xpad_ref[d:d + L, :], w1_ref[d],
                                     preferred_element_type=jnp.float32)

        # Exact GELU in f32 on the whole stacked accumulator (rows h >= H of a non-last
        # image are don't-care garbage and are never copied into hpad below).
        act = _gelu_exact(acc1_ref[...] + b1).astype(hpad_ref.dtype)
        for tb in range(TB):
            hpad_ref[tb * Hp + P:tb * Hp + P + H, :] = act[tb * Hp:tb * Hp + H, :]

        # --- Inception block 2: D banded matmuls, K = W*chid, N = W*cout -------------------
        acc2_ref[...] = jnp.dot(hpad_ref[0:L, :], w2_ref[0],
                                preferred_element_type=jnp.float32)
        for d in range(1, D):
            acc2_ref[...] += jnp.dot(hpad_ref[d:d + L, :], w2_ref[d],
                                     preferred_element_type=jnp.float32)

        y = acc2_ref[...] + b2
        # TODO(synk): pad cout so W*cout is a multiple of 128 for fully lane-dense,
        # unmasked output stores at realistic TimesNet channel counts.
        for tb in range(TB):
            out_ref[tb, :, :] = y[tb * Hp:tb * Hp + H, :]

    return kernel


def _const_block_spec(shape, index_map):
    """Single-buffer constant-index blocks (weights/biases): their block never changes
    across grid steps, so default double-buffering only wastes VMEM."""
    if hasattr(pl, "Buffered"):
        try:
            return pl.BlockSpec(shape, index_map, pipeline_mode=pl.Buffered(1))
        except TypeError:
            pass
    return pl.BlockSpec(shape, index_map)


@functools.lru_cache(maxsize=None)
def _build_fused_call(B, TB, H, W, cin, chid, cout, P):
    Hp = H + 2 * P
    D = 2 * P + 1
    L = TB * Hp - 2 * P
    kernel = _make_fused_kernel(TB, H, W, cin, chid, cout, P)

    # Footprint-derived VMEM budget (x2 safety for (8,128) tile padding), capped so it also
    # fits v7x's 64 MiB physical VMEM.
    est = ((TB * Hp * W * cin + TB * Hp * W * chid) * 2            # padded scratch (bf16)
           + (L * W * chid + L * W * cout) * 4                     # f32 accumulators
           + (D * W * cin * W * chid + D * W * chid * W * cout) * 2  # bands, single-buffered
           + (W * chid + W * cout) * 4                             # biases
           + 2 * TB * H * W * cin * 2 + 2 * TB * H * W * cout * 4)  # double-buffered in/out
    vmem_limit = int(min(max(32 << 20, 2 * est), 48 << 20))
    # TODO(synk): for realistic TimesNet configs (num_kernels=6, large periods) the banded
    # weights are W-quadratic; add a width-tile grid axis (with +/-P halo folded into K) or
    # stream per-band slices from HBM (memory_space=pl.ANY) instead of holding them resident.

    call = pl.pallas_call(
        kernel,
        out_shape=jax.ShapeDtypeStruct((B, H, W * cout), jnp.float32),
        grid=(B // TB,),
        in_specs=[
            pl.BlockSpec((TB, H, W * cin), lambda g: (g, 0, 0)),
            _const_block_spec((D, W * cin, W * chid), lambda g: (0, 0, 0)),
            _const_block_spec((1, W * chid), lambda g: (0, 0)),
            _const_block_spec((D, W * chid, W * cout), lambda g: (0, 0, 0)),
            _const_block_spec((1, W * cout), lambda g: (0, 0)),
        ],
        out_specs=pl.BlockSpec((TB, H, W * cout), lambda g: (g, 0, 0)),
        scratch_shapes=[
            pltpu.VMEM((TB * Hp, W * cin), jnp.bfloat16),    # flat padded input
            pltpu.VMEM((TB * Hp, W * chid), jnp.bfloat16),   # flat padded GELU intermediate
            pltpu.VMEM((L, W * chid), jnp.float32),          # conv1 accumulator
            pltpu.VMEM((L, W * cout), jnp.float32),          # conv2 accumulator
        ],
        compiler_params=pltpu.CompilerParams(
            dimension_semantics=("parallel",),
            vmem_limit_bytes=vmem_limit,
        ),
    )
    return jax.jit(call)


def inception_fused(img, band1, b1t, band2, b2t, *, P, TB):
    """img: (B, H, W, Cin) f32 -> (B, H, W, Cout) f32 via the fused Pallas kernel."""
    B, H, W, cin = img.shape
    chid = band1.shape[-1] // W
    cout = band2.shape[-1] // W
    x2 = img.reshape(B, H, W * cin).astype(jnp.bfloat16)      # lane-dense row layout
    call = _build_fused_call(B, TB, H, W, cin, chid, cout, P)
    y = call(x2, band1, b1t, band2, b2t)
    return y.reshape(B, H, W, cout)


# ----------------------------------------------------------------------------
# Host-side parameter packing
# ----------------------------------------------------------------------------
def init_inception_params(key, cin, cout, num_kernels):
    ws, bs = [], []
    for i in range(num_kernels):
        k = 2 * i + 1
        key, k1, k2 = jax.random.split(key, 3)
        fan_in = cin * k * k
        ws.append(jax.random.normal(k1, (cout, cin, k, k), jnp.float32)
                  * (2.0 / fan_in) ** 0.5)
        bs.append(jax.random.normal(k2, (cout,), jnp.float32) * 0.02)
    return ws, bs


def summed_tap_weights(ws, num_kernels):
    """Merge the num_kernels Conv2d weights (sizes 1,3,..,2nk-1, 'same' padding) into one
    (2P+1, 2P+1, Cin, Cout) tap tensor already scaled by 1/num_kernels (mean is linear)."""
    P = num_kernels - 1
    cout, cin = np.asarray(jax.device_get(ws[0])).shape[:2]
    wsum = np.zeros((2 * P + 1, 2 * P + 1, cin, cout), np.float32)
    for i, w in enumerate(ws):
        w_np = np.asarray(jax.device_get(w))                  # (cout, cin, k, k)
        k = 2 * i + 1
        off = P - i
        wsum[off:off + k, off:off + k] += np.transpose(w_np, (2, 3, 1, 0)) / num_kernels
    return wsum                                               # index [P+dh, P+dw, ci, co]


def build_bands(wsum, W):
    """Expand the summed tap tensor into 2P+1 width-banded matmul weights:
       band[d, w_in*cin+ci, w_out*cout+co] = wsum[d, w_in-w_out+P, ci, co]  (0 if |dw|>P).
       'Same' padding along the width is realised by omitting out-of-range columns."""
    D, _, cin, cout = wsum.shape
    P = (D - 1) // 2
    band = np.zeros((D, W * cin, W * cout), np.float32)
    for w_out in range(W):
        for dw in range(-P, P + 1):
            w_in = w_out + dw
            if 0 <= w_in < W:
                band[:, w_in * cin:(w_in + 1) * cin,
                     w_out * cout:(w_out + 1) * cout] = wsum[:, dw + P]
    return band


def _pick_tb(B):
    """>=2 grid steps when possible (keeps both v7x TensorCores busy via the 'parallel'
    grid axis); on 1-TC chips the extra step costs ~0.35us, negligible vs. the matmuls."""
    if B <= 1:
        return 1
    for tb in range(B // 2, 0, -1):
        if B % tb == 0:
            return tb
    return 1


def make_conv_pallas(wsum1, b1_mean, wsum2, b2_mean, num_kernels, TB=None):
    P = num_kernels - 1
    b1 = np.asarray(b1_mean, np.float32)
    b2 = np.asarray(b2_mean, np.float32)
    packed_cache = {}       # per-W device uploads of the banded weights / tiled biases

    def get_packed(W):
        if W not in packed_cache:
            band1 = jnp.asarray(build_bands(wsum1, W), jnp.bfloat16)
            band2 = jnp.asarray(build_bands(wsum2, W), jnp.bfloat16)
            b1t = jnp.asarray(np.tile(b1, W)[None, :], jnp.float32)
            b2t = jnp.asarray(np.tile(b2, W)[None, :], jnp.float32)
            packed_cache[W] = (band1, b1t, band2, b2t)
        return packed_cache[W]

    def conv(img):
        B, H, W, _ = img.shape
        band1, b1t, band2, b2t = get_packed(W)
        tb = TB if (TB is not None and B % TB == 0) else _pick_tb(B)
        return inception_fused(img, band1, b1t, band2, b2t, P=P, TB=tb)

    return conv


# ----------------------------------------------------------------------------
# FFT_for_Period (host-side glue: data-dependent shapes -> must sync to host)
# TODO(synk): bucket `length` to a small set of sizes to bound recompiles at real scales.
# ----------------------------------------------------------------------------
def fft_for_period(x, k):
    xf = jnp.fft.rfft(x, axis=1, norm='ortho')
    amp = jnp.abs(xf)
    freq = amp.mean(axis=0).mean(axis=-1)
    freq = freq.at[0].set(0.0)
    _, top = jax.lax.top_k(freq, k)
    top_np = np.asarray(jax.device_get(top))
    periods = x.shape[1] // top_np
    period_weight = amp.mean(axis=-1)[:, top_np]
    return periods, period_weight


# ----------------------------------------------------------------------------
# TimesBlock forward (period loop, softmax weighting, residual: plain JAX glue)
# ----------------------------------------------------------------------------
def times_block_forward(x, conv_fn, *, top_k, input_len, output_len):
    B, T, N = x.shape
    periods, period_weight = fft_for_period(x, top_k)
    total = input_len + output_len
    res = []
    for i in range(top_k):
        period = int(periods[i])
        if total % period != 0:
            length = (total // period + 1) * period
            pad = jnp.zeros((B, length - total, N), x.dtype)
            out = jnp.concatenate([x, pad], axis=1)
        else:
            length = total
            out = x
        img = out.reshape(B, length // period, period, N)     # NHWC "image"
        y = conv_fn(img)                                       # fused inception->gelu->inception
        res.append(y.reshape(B, length, N)[:, :total, :])
    res = jnp.stack(res, axis=-1)                              # (B, T, N, k)
    pw = jax.nn.softmax(period_weight, axis=1)                 # (B, k)
    return jnp.sum(res * pw[:, None, None, :], axis=-1) + x


# ----------------------------------------------------------------------------
# References for the numerical sanity checks
# ----------------------------------------------------------------------------
def make_conv_reference_bf16(wsum1, b1_mean, wsum2, b2_mean, num_kernels):
    """XLA-conv reference matching the kernel's precision policy exactly
    (bf16 inputs/weights, f32 accumulate, f32 bias+GELU, bf16 intermediate)."""
    P = num_kernels - 1
    w1 = jnp.asarray(wsum1).astype(jnp.bfloat16)               # HWIO
    w2 = jnp.asarray(wsum2).astype(jnp.bfloat16)
    b1 = jnp.asarray(b1_mean, jnp.float32)
    b2 = jnp.asarray(b2_mean, jnp.float32)

    def conv(img):
        x = img.astype(jnp.bfloat16)
        y = jax.lax.conv_general_dilated(
            x, w1, (1, 1), [(P, P), (P, P)],
            dimension_numbers=('NHWC', 'HWIO', 'NHWC'),
            preferred_element_type=jnp.float32) + b1
        y = _gelu_exact(y).astype(jnp.bfloat16)
        y = jax.lax.conv_general_dilated(
            y, w2, (1, 1), [(P, P), (P, P)],
            dimension_numbers=('NHWC', 'HWIO', 'NHWC'),
            preferred_element_type=jnp.float32) + b2
        return y

    return conv


def make_conv_reference_f32(ws1, bs1, ws2, bs2):
    """Faithful full-f32 reference of the original module (mean of per-kernel-size Conv2d)."""
    def inception(x, ws, bs):
        outs = []
        for i, (w, b) in enumerate(zip(ws, bs)):
            wh = jnp.transpose(w, (2, 3, 1, 0))                # (k,k,Cin,Cout) HWIO
            o = jax.lax.conv_general_dilated(
                x, wh, (1, 1), [(i, i), (i, i)],
                dimension_numbers=('NHWC', 'HWIO', 'NHWC')) + b
            outs.append(o)
        return sum(outs) / len(outs)

    def conv(img):
        y = inception(img, ws1, bs1)
        y = jax.nn.gelu(y, approximate=False)                  # true exact GELU
        return inception(y, ws2, bs2)

    return conv


if __name__ == "__main__":
    # Small config: input_dim=16 (seq len), d_model=8, d_hidden=16, top_k=2,
    # num_kernels=2, task_name='classification' -> output_len=0.
    B, T, N = 2, 16, 8
    D_HIDDEN = 16
    NUM_KERNELS = 2
    TOP_K = 2
    INPUT_LEN, OUTPUT_LEN = T, 0

    key = jax.random.PRNGKey(0)
    kx, kp1, kp2 = jax.random.split(key, 3)
    x = jax.random.normal(kx, (B, T, N), jnp.float32)

    ws1, bs1 = init_inception_params(kp1, N, D_HIDDEN, NUM_KERNELS)   # d_model -> d_hidden
    ws2, bs2 = init_inception_params(kp2, D_HIDDEN, N, NUM_KERNELS)   # d_hidden -> d_model

    wsum1 = summed_tap_weights(ws1, NUM_KERNELS)
    wsum2 = summed_tap_weights(ws2, NUM_KERNELS)
    b1_mean = np.asarray(jax.device_get(sum(bs1) / NUM_KERNELS))
    b2_mean = np.asarray(jax.device_get(sum(bs2) / NUM_KERNELS))

    conv_pallas = make_conv_pallas(wsum1, b1_mean, wsum2, b2_mean, NUM_KERNELS)
    out = times_block_forward(x, conv_pallas, top_k=TOP_K,
                              input_len=INPUT_LEN, output_len=OUTPUT_LEN)
    out = jax.block_until_ready(out)

    # Check 1: matched-precision XLA conv reference (independent code path) -- tight tolerance.
    conv_ref = make_conv_reference_bf16(wsum1, b1_mean, wsum2, b2_mean, NUM_KERNELS)
    ref = jax.block_until_ready(times_block_forward(
        x, conv_ref, top_k=TOP_K, input_len=INPUT_LEN, output_len=OUTPUT_LEN))

    # Check 2: faithful full-f32 mean-of-Conv2d reference of the PyTorch module --
    #          looser tolerance that covers the intentional bf16 cast in the kernel.
    conv_f32 = make_conv_reference_f32(ws1, bs1, ws2, bs2)
    ref32 = jax.block_until_ready(times_block_forward(
        x, conv_f32, top_k=TOP_K, input_len=INPUT_LEN, output_len=OUTPUT_LEN))

    assert out.shape == (B, T, N) and out.dtype == jnp.float32
    assert bool(jnp.all(jnp.isfinite(out)))
    np.testing.assert_allclose(np.asarray(out), np.asarray(ref), rtol=5e-3, atol=5e-3)
    np.testing.assert_allclose(np.asarray(out), np.asarray(ref32), rtol=5e-2, atol=5e-2)
    print("KERNEL_OK")
</pallas_src>

<mosaic_0001>
module attributes {stable_mosaic.version = 11 : i64} {
  func.func @kernel(%arg0: i32, %arg1: memref<1x4x32xbf16, #tpu.memory_space<vmem>>, %arg2: memref<3x32x64xbf16, #tpu.memory_space<vmem>>, %arg3: memref<1x64xf32, #tpu.memory_space<vmem>>, %arg4: memref<3x64x32xbf16, #tpu.memory_space<vmem>>, %arg5: memref<1x32xf32, #tpu.memory_space<vmem>>, %arg6: memref<1x4x32xf32, #tpu.memory_space<vmem>>, %arg7: memref<6x32xbf16, #tpu.memory_space<vmem>>, %arg8: memref<6x64xbf16, #tpu.memory_space<vmem>>, %arg9: memref<4x64xf32, #tpu.memory_space<vmem>>, %arg10: memref<4x32xf32, #tpu.memory_space<vmem>>) attributes {dimension_semantics = [#tpu.dimension_semantics<parallel>], iteration_bounds = array<i64: 2>, scalar_prefetch = 0 : i64, scratch_operands = 4 : i64, tpu.core_type = #tpu.core_type<tc>, window_params = [{transform_indices = @transform_0, window_bounds = array<i64: 1, 4, 32>}, {pipeline_mode = #tpu.pipeline_mode<synchronous>, transform_indices = @transform_1, window_bounds = array<i64: 3, 32, 64>}, {pipeline_mode = #tpu.pipeline_mode<synchronous>, transform_indices = @transform_2, window_bounds = array<i64: 1, 64>}, {pipeline_mode = #tpu.pipeline_mode<synchronous>, transform_indices = @transform_3, window_bounds = array<i64: 3, 64, 32>}, {pipeline_mode = #tpu.pipeline_mode<synchronous>, transform_indices = @transform_4, window_bounds = array<i64: 1, 32>}, {transform_indices = @transform_5, window_bounds = array<i64: 1, 4, 32>}]} {
    %cst = arith.constant 0.000000e+00 : bf16
    %0 = vector.broadcast %cst : bf16 to vector<1x32xbf16>
    %cst_0 = arith.constant 0.000000e+00 : bf16
    %1 = vector.broadcast %cst_0 : bf16 to vector<1x64xbf16>
    %c0 = arith.constant 0 : index
    %c0_1 = arith.constant 0 : index
    %2 = vector.load %arg7[%c0, %c0_1] : memref<6x32xbf16, #tpu.memory_space<vmem>>, vector<1x32xbf16>
    tpu.vector_store %arg7[%c0, %c0_1], %0 {strides = array<i32>} : memref<6x32xbf16, #tpu.memory_space<vmem>>, vector<1x32xbf16>,
    %c5 = arith.constant 5 : index
    %c0_2 = arith.constant 0 : index
    %3 = vector.load %arg7[%c5, %c0_2] : memref<6x32xbf16, #tpu.memory_space<vmem>>, vector<1x32xbf16>
    tpu.vector_store %arg7[%c5, %c0_2], %0 {strides = array<i32>} : memref<6x32xbf16, #tpu.memory_space<vmem>>, vector<1x32xbf16>,
    %c0_3 = arith.constant 0 : index
    %c0_4 = arith.constant 0 : index
    %4 = vector.load %arg8[%c0_3, %c0_4] : memref<6x64xbf16, #tpu.memory_space<vmem>>, vector<1x64xbf16>
    tpu.vector_store %arg8[%c0_3, %c0_4], %1 {strides = array<i32>} : memref<6x64xbf16, #tpu.memory_space<vmem>>, vector<1x64xbf16>,
    %c5_5 = arith.constant 5 : index
    %c0_6 = arith.constant 0 : index
    %5 = vector.load %arg8[%c5_5, %c0_6] : memref<6x64xbf16, #tpu.memory_space<vmem>>, vector<1x64xbf16>
    tpu.vector_store %arg8[%c5_5, %c0_6], %1 {strides = array<i32>} : memref<6x64xbf16, #tpu.memory_space<vmem>>, vector<1x64xbf16>,
    %c0_7 = arith.constant 0 : index
    %c0_8 = arith.constant 0 : index
    %c0_9 = arith.constant 0 : index
    %6 = vector.load %arg1[%c0_7, %c0_8, %c0_9] : memref<1x4x32xbf16, #tpu.memory_space<vmem>>, vector<1x4x32xbf16>
    %7 = vector.shape_cast %6 : vector<1x4x32xbf16> to vector<4x32xbf16>
    %c1 = arith.constant 1 : index
    %c0_10 = arith.constant 0 : index
    %8 = vector.load %arg7[%c1, %c0_10] : memref<6x32xbf16, #tpu.memory_space<vmem>>, vector<4x32xbf16>
    tpu.vector_store %arg7[%c1, %c0_10], %7 {strides = array<i32>} : memref<6x32xbf16, #tpu.memory_space<vmem>>, vector<4x32xbf16>,
    %c0_11 = arith.constant 0 : index
    %c0_12 = arith.constant 0 : index
    %9 = vector.load %arg3[%c0_11, %c0_12] : memref<1x64xf32, #tpu.memory_space<vmem>>, vector<1x64xf32>
    %c0_13 = arith.constant 0 : index
    %c0_14 = arith.constant 0 : index
    %10 = vector.load %arg5[%c0_13, %c0_14] : memref<1x32xf32, #tpu.memory_space<vmem>>, vector<1x32xf32>
    %c0_15 = arith.constant 0 : index
    %c0_16 = arith.constant 0 : index
    %11 = vector.load %arg7[%c0_15, %c0_16] : memref<6x32xbf16, #tpu.memory_space<vmem>>, vector<4x32xbf16>
    %c0_17 = arith.constant 0 : index
    %c0_18 = arith.constant 0 : index
    %c0_19 = arith.constant 0 : index
    %12 = vector.load %arg2[%c0_17, %c0_18, %c0_19] : memref<3x32x64xbf16, #tpu.memory_space<vmem>>, vector<1x32x64xbf16>
    %13 = vector.shape_cast %12 : vector<1x32x64xbf16> to vector<32x64xbf16>
    %cst_20 = arith.constant dense<0.000000e+00> : vector<4x64xf32>
    %14 = tpu.matmul %11, %13, %cst_20 {dimension_numbers = #tpu.dot_dimension_numbers<[1], [0], [0], [1], [0, 0, 1, 1], [], []>} : vector<4x32xbf16>, vector<32x64xbf16>, vector<4x64xf32> -> vector<4x64xf32>
    %c0_21 = arith.constant 0 : index
    %c0_22 = arith.constant 0 : index
    %15 = vector.load %arg9[%c0_21, %c0_22] : memref<4x64xf32, #tpu.memory_space<vmem>>, vector<4x64xf32>
    tpu.vector_store %arg9[%c0_21, %c0_22], %14 {strides = array<i32>} : memref<4x64xf32, #tpu.memory_space<vmem>>, vector<4x64xf32>,
    %c0_23 = arith.constant 0 : index
    %c0_24 = arith.constant 0 : index
    %16 = vector.load %arg9[%c0_23, %c0_24] : memref<4x64xf32, #tpu.memory_space<vmem>>, vector<4x64xf32>
    %c1_25 = arith.constant 1 : index
    %c0_26 = arith.constant 0 : index
    %17 = vector.load %arg7[%c1_25, %c0_26] : memref<6x32xbf16, #tpu.memory_space<vmem>>, vector<4x32xbf16>
    %c1_27 = arith.constant 1 : index
    %c0_28 = arith.constant 0 : index
    %c0_29 = arith.constant 0 : index
    %18 = vector.load %arg2[%c1_27, %c0_28, %c0_29] : memref<3x32x64xbf16, #tpu.memory_space<vmem>>, vector<1x32x64xbf16>
    %19 = vector.shape_cast %18 : vector<1x32x64xbf16> to vector<32x64xbf16>
    %cst_30 = arith.constant dense<0.000000e+00> : vector<4x64xf32>
    %20 = tpu.matmul %17, %19, %cst_30 {dimension_numbers = #tpu.dot_dimension_numbers<[1], [0], [0], [1], [0, 0, 1, 1], [], []>} : vector<4x32xbf16>, vector<32x64xbf16>, vector<4x64xf32> -> vector<4x64xf32>
    %21 = arith.addf %16, %20 : vector<4x64xf32>
    %c0_31 = arith.constant 0 : index
    %c0_32 = arith.constant 0 : index
    %22 = vector.load %arg9[%c0_31, %c0_32] : memref<4x64xf32, #tpu.memory_space<vmem>>, vector<4x64xf32>
    tpu.vector_store %arg9[%c0_31, %c0_32], %21 {strides = array<i32>} : memref<4x64xf32, #tpu.memory_space<vmem>>, vector<4x64xf32>,
    %c0_33 = arith.constant 0 : index
    %c0_34 = arith.constant 0 : index
    %23 = vector.load %arg9[%c0_33, %c0_34] : memref<4x64xf32, #tpu.memory_space<vmem>>, vector<4x64xf32>
    %c2 = arith.constant 2 : index
    %c0_35 = arith.constant 0 : index
    %24 = vector.load %arg7[%c2, %c0_35] : memref<6x32xbf16, #tpu.memory_space<vmem>>, vector<4x32xbf16>
    %c2_36 = arith.constant 2 : index
    %c0_37 = arith.constant 0 : index
    %c0_38 = arith.constant 0 : index
    %25 = vector.load %arg2[%c2_36, %c0_37, %c0_38] : memref<3x32x64xbf16, #tpu.memory_space<vmem>>, vector<1x32x64xbf16>
    %26 = vector.shape_cast %25 : vector<1x32x64xbf16> to vector<32x64xbf16>
    %cst_39 = arith.constant dense<0.000000e+00> : vector<4x64xf32>
    %27 = tpu.matmul %24, %26, %cst_39 {dimension_numbers = #tpu.dot_dimension_numbers<[1], [0], [0], [1], [0, 0, 1, 1], [], []>} : vector<4x32xbf16>, vector<32x64xbf16>, vector<4x64xf32> -> vector<4x64xf32>
    %28 = arith.addf %23, %27 : vector<4x64xf32>
    %c0_40 = arith.constant 0 : index
    %c0_41 = arith.constant 0 : index
    %29 = vector.load %arg9[%c0_40, %c0_41] : memref<4x64xf32, #tpu.memory_space<vmem>>, vector<4x64xf32>
    tpu.vector_store %arg9[%c0_40, %c0_41], %28 {strides = array<i32>} : memref<4x64xf32, #tpu.memory_space<vmem>>, vector<4x64xf32>,
    %c0_42 = arith.constant 0 : index
    %c0_43 = arith.constant 0 : index
    %30 = vector.load %arg9[%c0_42, %c0_43] : memref<4x64xf32, #tpu.memory_space<vmem>>, vector<4x64xf32>
    %31 = vector.broadcast %9 : vector<1x64xf32> to vector<4x64xf32>
    %32 = arith.addf %30, %31 : vector<4x64xf32>
    %cst_44 = arith.constant 5.000000e-01 : f32
    %33 = vector.broadcast %cst_44 : f32 to vector<4x64xf32>
    %34 = arith.mulf %33, %32 : vector<4x64xf32>
    %cst_45 = arith.constant 0.707106769 : f32
    %35 = vector.broadcast %cst_45 : f32 to vector<4x64xf32>
    %36 = arith.mulf %32, %35 : vector<4x64xf32>
    %37 = math.absf %36 : vector<4x64xf32>
    %cst_46 = arith.constant 0.327591091 : f32
    %38 = vector.broadcast %cst_46 : f32 to vector<4x64xf32>
    %39 = arith.mulf %38, %37 : vector<4x64xf32>
    %cst_47 = arith.constant 1.000000e+00 : f32
    %40 = vector.broadcast %cst_47 : f32 to vector<4x64xf32>
    %41 = arith.addf %40, %39 : vector<4x64xf32>
    %cst_48 = arith.constant 1.000000e+00 : f32
    %42 = vector.broadcast %cst_48 : f32 to vector<4x64xf32>
    %43 = arith.divf %42, %41 : vector<4x64xf32>
    %cst_49 = arith.constant 1.06140542 : f32
    %44 = vector.broadcast %cst_49 : f32 to vector<4x64xf32>
    %45 = arith.mulf %44, %43 : vector<4x64xf32>
    %cst_50 = arith.constant -1.45315206 : f32
    %46 = vector.broadcast %cst_50 : f32 to vector<4x64xf32>
    %47 = arith.addf %45, %46 : vector<4x64xf32>
    %48 = arith.mulf %47, %43 : vector<4x64xf32>
    %cst_51 = arith.constant 1.42141378 : f32
    %49 = vector.broadcast %cst_51 : f32 to vector<4x64xf32>
    %50 = arith.addf %48, %49 : vector<4x64xf32>
    %51 = arith.mulf %50, %43 : vector<4x64xf32>
    %cst_52 = arith.constant -0.284496725 : f32
    %52 = vector.broadcast %cst_52 : f32 to vector<4x64xf32>
    %53 = arith.addf %51, %52 : vector<4x64xf32>
    %54 = arith.mulf %53, %43 : vector<4x64xf32>
    %cst_53 = arith.constant 0.254829586 : f32
    %55 = vector.broadcast %cst_53 : f32 to vector<4x64xf32>
    %56 = arith.addf %54, %55 : vector<4x64xf32>
    %57 = arith.mulf %56, %43 : vector<4x64xf32>
    %cst_54 = arith.constant 0.000000e+00 : f32
    %58 = vector.broadcast %cst_54 : f32 to vector<4x64xf32>
    %59 = arith.subf %58, %37 : vector<4x64xf32>
    %60 = arith.mulf %59, %37 : vector<4x64xf32>
    %61 = math.exp %60 : vector<4x64xf32>
    %62 = arith.mulf %57, %61 : vector<4x64xf32>
    %cst_55 = arith.constant 1.000000e+00 : f32
    %63 = vector.broadcast %cst_55 : f32 to vector<4x64xf32>
    %64 = arith.subf %63, %62 : vector<4x64xf32>
    %cst_56 = arith.constant 0.000000e+00 : f32
    %65 = vector.broadcast %cst_56 : f32 to vector<4x64xf32>
    %66 = arith.cmpf olt, %36, %65 : vector<4x64xf32>
    %cst_57 = arith.constant 0.000000e+00 : f32
    %67 = vector.broadcast %cst_57 : f32 to vector<4x64xf32>
    %68 = arith.subf %67, %64 : vector<4x64xf32>
    %69 = arith.select %66, %68, %64 : vector<4x64xi1>, vector<4x64xf32>
    %cst_58 = arith.constant 1.000000e+00 : f32
    %70 = vector.broadcast %cst_58 : f32 to vector<4x64xf32>
    %71 = arith.addf %70, %69 : vector<4x64xf32>
    %72 = arith.mulf %34, %71 : vector<4x64xf32>
    %73 = arith.truncf %72 : vector<4x64xf32> to vector<4x64xbf16>
    %c1_59 = arith.constant 1 : index
    %c0_60 = arith.constant 0 : index
    %74 = vector.load %arg8[%c1_59, %c0_60] : memref<6x64xbf16, #tpu.memory_space<vmem>>, vector<4x64xbf16>
    tpu.vector_store %arg8[%c1_59, %c0_60], %73 {strides = array<i32>} : memref<6x64xbf16, #tpu.memory_space<vmem>>, vector<4x64xbf16>,
    %c0_61 = arith.constant 0 : index
    %c0_62 = arith.constant 0 : index
    %75 = vector.load %arg8[%c0_61, %c0_62] : memref<6x64xbf16, #tpu.memory_space<vmem>>, vector<4x64xbf16>
    %c0_63 = arith.constant 0 : index
    %c0_64 = arith.constant 0 : index
    %c0_65 = arith.constant 0 : index
    %76 = vector.load %arg4[%c0_63, %c0_64, %c0_65] : memref<3x64x32xbf16, #tpu.memory_space<vmem>>, vector<1x64x32xbf16>
    %77 = vector.shape_cast %76 : vector<1x64x32xbf16> to vector<64x32xbf16>
    %cst_66 = arith.constant dense<0.000000e+00> : vector<4x32xf32>
    %78 = tpu.matmul %75, %77, %cst_66 {dimension_numbers = #tpu.dot_dimension_numbers<[1], [0], [0], [1], [0, 0, 1, 1], [], []>} : vector<4x64xbf16>, vector<64x32xbf16>, vector<4x32xf32> -> vector<4x32xf32>
    %c0_67 = arith.constant 0 : index
    %c0_68 = arith.constant 0 : index
    %79 = vector.load %arg10[%c0_67, %c0_68] : memref<4x32xf32, #tpu.memory_space<vmem>>, vector<4x32xf32>
    tpu.vector_store %arg10[%c0_67, %c0_68], %78 {strides = array<i32>} : memref<4x32xf32, #tpu.memory_space<vmem>>, vector<4x32xf32>,
    %c0_69 = arith.constant 0 : index
    %c0_70 = arith.constant 0 : index
    %80 = vector.load %arg10[%c0_69, %c0_70] : memref<4x32xf32, #tpu.memory_space<vmem>>, vector<4x32xf32>
    %c1_71 = arith.constant 1 : index
    %c0_72 = arith.constant 0 : index
    %81 = vector.load %arg8[%c1_71, %c0_72] : memref<6x64xbf16, #tpu.memory_space<vmem>>, vector<4x64xbf16>
    %c1_73 = arith.constant 1 : index
    %c0_74 = arith.constant 0 : index
    %c0_75 = arith.constant 0 : index
    %82 = vector.load %arg4[%c1_73, %c0_74, %c0_75] : memref<3x64x32xbf16, #tpu.memory_space<vmem>>, vector<1x64x32xbf16>
    %83 = vector.shape_cast %82 : vector<1x64x32xbf16> to vector<64x32xbf16>
    %cst_76 = arith.constant dense<0.000000e+00> : vector<4x32xf32>
    %84 = tpu.matmul %81, %83, %cst_76 {dimension_numbers = #tpu.dot_dimension_numbers<[1], [0], [0], [1], [0, 0, 1, 1], [], []>} : vector<4x64xbf16>, vector<64x32xbf16>, vector<4x32xf32> -> vector<4x32xf32>
    %85 = arith.addf %80, %84 : vector<4x32xf32>
    %c0_77 = arith.constant 0 : index
    %c0_78 = arith.constant 0 : index
    %86 = vector.load %arg10[%c0_77, %c0_78] : memref<4x32xf32, #tpu.memory_space<vmem>>, vector<4x32xf32>
    tpu.vector_store %arg10[%c0_77, %c0_78], %85 {strides = array<i32>} : memref<4x32xf32, #tpu.memory_space<vmem>>, vector<4x32xf32>,
    %c0_79 = arith.constant 0 : index
    %c0_80 = arith.constant 0 : index
    %87 = vector.load %arg10[%c0_79, %c0_80] : memref<4x32xf32, #tpu.memory_space<vmem>>, vector<4x32xf32>
    %c2_81 = arith.constant 2 : index
    %c0_82 = arith.constant 0 : index
    %88 = vector.load %arg8[%c2_81, %c0_82] : memref<6x64xbf16, #tpu.memory_space<vmem>>, vector<4x64xbf16>
    %c2_83 = arith.constant 2 : index
    %c0_84 = arith.constant 0 : index
    %c0_85 = arith.constant 0 : index
    %89 = vector.load %arg4[%c2_83, %c0_84, %c0_85] : memref<3x64x32xbf16, #tpu.memory_space<vmem>>, vector<1x64x32xbf16>
    %90 = vector.shape_cast %89 : vector<1x64x32xbf16> to vector<64x32xbf16>
    %cst_86 = arith.constant dense<0.000000e+00> : vector<4x32xf32>
    %91 = tpu.matmul %88, %90, %cst_86 {dimension_numbers = #tpu.dot_dimension_numbers<[1], [0], [0], [1], [0, 0, 1, 1], [], []>} : vector<4x64xbf16>, vector<64x32xbf16>, vector<4x32xf32> -> vector<4x32xf32>
    %92 = arith.addf %87, %91 : vector<4x32xf32>
    %c0_87 = arith.constant 0 : index
    %c0_88 = arith.constant 0 : index
    %93 = vector.load %arg10[%c0_87, %c0_88] : memref<4x32xf32, #tpu.memory_space<vmem>>, vector<4x32xf32>
    tpu.vector_store %arg10[%c0_87, %c0_88], %92 {strides = array<i32>} : memref<4x32xf32, #tpu.memory_space<vmem>>, vector<4x32xf32>,
    %c0_89 = arith.constant 0 : index
    %c0_90 = arith.constant 0 : index
    %94 = vector.load %arg10[%c0_89, %c0_90] : memref<4x32xf32, #tpu.memory_space<vmem>>, vector<4x32xf32>
    %95 = vector.broadcast %10 : vector<1x32xf32> to vector<4x32xf32>
    %96 = arith.addf %94, %95 : vector<4x32xf32>
    %c0_91 = arith.constant 0 : index
    %c0_92 = arith.constant 0 : index
    %c0_93 = arith.constant 0 : index
    %97 = vector.load %arg6[%c0_91, %c0_92, %c0_93] : memref<1x4x32xf32, #tpu.memory_space<vmem>>, vector<1x4x32xf32>
    %98 = vector.shape_cast %97 : vector<1x4x32xf32> to vector<4x32xf32>
    %99 = vector.shape_cast %96 : vector<4x32xf32> to vector<1x4x32xf32>
    tpu.vector_store %arg6[%c0_91, %c0_92, %c0_93], %99 {strides = array<i32>} : memref<1x4x32xf32, #tpu.memory_space<vmem>>, vector<1x4x32xf32>,
    return
  }
  func.func @transform_0(%arg0: i32) -> (i32, i32, i32) {
    %c0_i32 = arith.constant 0 : i32
    %c0_i32_0 = arith.constant 0 : i32
    %c0_i32_1 = arith.constant 0 : i32
    return %arg0, %c0_i32, %c0_i32_0 : i32, i32, i32
  }
  func.func @transform_1(%arg0: i32) -> (i32, i32, i32) {
    %c0_i32 = arith.constant 0 : i32
    %c0_i32_0 = arith.constant 0 : i32
    %c0_i32_1 = arith.constant 0 : i32
    %c0_i32_2 = arith.constant 0 : i32
    return %c0_i32, %c0_i32_0, %c0_i32_1 : i32, i32, i32
  }
  func.func @transform_2(%arg0: i32) -> (i32, i32) {
    %c0_i32 = arith.constant 0 : i32
    %c0_i32_0 = arith.constant 0 : i32
    %c0_i32_1 = arith.constant 0 : i32
    return %c0_i32, %c0_i32_0 : i32, i32
  }
  func.func @transform_3(%arg0: i32) -> (i32, i32, i32) {
    %c0_i32 = arith.constant 0 : i32
    %c0_i32_0 = arith.constant 0 : i32
    %c0_i32_1 = arith.constant 0 : i32
    %c0_i32_2 = arith.constant 0 : i32
    return %c0_i32, %c0_i32_0, %c0_i32_1 : i32, i32, i32
  }
  func.func @transform_4(%arg0: i32) -> (i32, i32) {
    %c0_i32 = arith.constant 0 : i32
    %c0_i32_0 = arith.constant 0 : i32
    %c0_i32_1 = arith.constant 0 : i32
    return %c0_i32, %c0_i32_0 : i32, i32
  }
  func.func @transform_5(%arg0: i32) -> (i32, i32, i32) {
    %c0_i32 = arith.constant 0 : i32
    %c0_i32_0 = arith.constant 0 : i32
    %c0_i32_1 = arith.constant 0 : i32
    return %arg0, %c0_i32, %c0_i32_0 : i32, i32, i32
  }
}

</mosaic_0001>

<bundles_post_ra>
// kernel: tpu_custom_call.1
= control target key start
LH: loop header
LB: loop body
LE: loop exit
PB: predicated region body
PF: predicated region fallthrough
CT: control target
= control target key end

     0   :  { %10 = vsyncpa [#allocation7], 0  ;;  %s1369_s0 = inlined_call_operand.vmem [shape: bf16[2,4,32], index: 0, kind: input, shape index: {}]   ;;  %s1370_s1 = inlined_call_operand.vmem [shape: bf16[3,32,64], index: 1, kind: input, shape index: {}]   ;;  %s1371_s2 = inlined_call_operand.vmem [shape: f32[1,64], index: 2, kind: input, shape index: {}]   ;;  %s1372_s3 = inlined_call_operand.vmem [shape: bf16[3,64,32], index: 3, kind: input, shape index: {}]   ;;  %s1373_s4 = inlined_call_operand.vmem [shape: f32[1,32], index: 4, kind: input, shape index: {}]   ;;  %s1374_s5 = inlined_call_operand.hbm [shape: f32[2,4,32], index: 5, kind: output, shape index: {}]  }
   0x1   :  { %12 = vsyncpa [#allocation7 + $0x1], 0  ;;  %s1173_s18 = smov 0   ;;  %s1175_s19 = smov 0  }
   0x2   :  { %s1177_s20 = smov 0   ;;  %s1179_s21 = smov 0  }
   0x3 LB: > { %s1194_s22 = sadd.s32 4294967295, %s1138_s21   ;;  %s860_s23 = sadd.s32 4294967294, %s1138_s21   ;;  %s1138_s21 = sphi %s1179_s21, %s1380_s21   ;;  %s1134_s20 = sphi %s1177_s20, %s1379_s20   ;;  %s1130_s19 = sphi %s1175_s19, %s1378_s19   ;;  %s1126_s18 = sphi %s1173_s18, %s1377_s18  }
   0x4   : > { %s1198_s24 = sadd.s32 1, %s1138_s21   ;;  %s135_s25 = sadd.s32 1, %s1134_s20 }
   0x5   : > { %s132_s26 = ssub.s32 %s1138_s21, %s1198_s24  ;;  %p145_p0 = scmp.ne.s32.totalorder %s1134_s20, %s1130_s19 }
   0x6   : > { %p133_p1 = scmp.eq.s32.totalorder %s132_s26, 0  ;;  %p146_p2 = scmp.eq.s32.totalorder %s1194_s22, 1 }
   0x7   : > { %p151_p3 = scmp.ne.s32.totalorder %s1130_s19, %s1126_s18  ;;  %p152_p4 = scmp.eq.s32.totalorder %s860_s23, 1 }
   0x8   : > { %s1209_s27 = scalar_select %p133_p1, %s1134_s20, %s135_s25  }
   0x9   : > { %p1211_p5 = por %p146_p2, %p145_p0  ;;  %p1215_p6 = por %p152_p4, %p151_p3 }
   0xa   : > { %p863_p7 = scmp.ge.s32.totalorder %s1138_s21, 1  ;;  %p189_p8 = scmp.lt.s32.totalorder %s1138_s21, 3 }
   0xc   : > { %p190_p9 = pnand %p863_p7, %p189_p8 }
   0xd   : > { %p216_p10 = scmp.lt.s32.totalorder (!%p190_p9), %s1194_s22, 1  ;;  %s213_s16 = sand.u32 (!%p190_p9), 1, %s1130_s19  }
   0xe   : > { %193 = sbr.rel (%p190_p9) target bundleno = 568 (0x238), region = 40  ;;  %s864_s17 = sshll.u32 (!%p190_p9), %s213_s16, 2 }
   0xf   : > { %s923_s26 = sshll.u32 (!%p190_p9), %s1194_s22, 6  ;;  %s215_s30 = scalar_lea.vmem (!%p190_p9), [#allocation6], %s864_s17 }
  0x10   : > { %s801_s6 = sshll.u32 (!%p190_p9), %s215_s30, 4  ;;  %s788_s10 = scalar_lea.sflag (!%p190_p9), [#allocation7], %s213_s16  ;;  %s802_s6 = int_to_ptr.vmem [resolvable:$true] %s801_s6 }
  0x11   : > { %s1078_s11 = scalar_lea.vmem (!%p190_p9), %s802_s6, 64 }
  0x12   : > { %p1079_p11 = scmp.ne.s32.totalorder (!%p190_p9), %s802_s6, %s1078_s11 }
  0x13   : > { %v1052_v0 = vld [vmem:[%s1370_s1 + $0x8] sm:$0xff]   ;;  %v1140_v1 = vmov 0.0   ;;  %v1053_v2 = vld [vmem:[%s1370_s1] sm:$0xff]   ;;  %vm1141_vm0 = vmmov 0   ;;  %vm221_vm1 = vcmask 253952   ;;  %vm227_vm4 = vcmask 256002  }
  0x14   : > { %951 = vmatprep.subr.bf16.mxu0 %v1140_v1  ;;  %959 = vmatprep.subr.bf16.mxu1 %v1140_v1  ;;  %vm222_vm2 = vsmask.f32 256  ;;  %v224_v3 = vld [vmem:[#allocation2] sm:$0x1]  ;;  %vm228_vm5 = vsmask.f32 7946  ;;  %p1080_p12 = pnand %p1079_p11, %p1211_p5 }
  0x15   : > { %952 = vmatpush3.bf16.msra.mxu0 %v1052_v0  ;;  %955 = vmatprep.mubr.msk.bf16.mxu0 %vm1141_vm0, %v1140_v1  ;;  %vm223_vm3 = vmand %vm221_vm1, %vm222_vm2  ;;  %v230_v4 = vld [vmem:[#allocation2] sm:$0x4]  ;;  %s217_s9 = scalar_select %p216_p10, %s1194_s22, 1  ;;  %v1054_v7 = vld [vmem:[%s1370_s1 + $0x18] sm:$0xff]   ;;  %vm260_vm7 = vcmask 256000   ;;  %vm285_vm10 = vcmask 261120  }
  0x16   : > { %953 = vmatprep.subr.bf16.mxu0 %v1140_v1  ;;  %963 = vmatprep.mubr.msk.bf16.mxu1 %vm1141_vm0, %v1140_v1  ;;  %v225_v5 = vsel %vm223_vm3, 0, %v224_v3  ;;  %vm229_vm6 = vmand %vm227_vm4, %vm228_vm5  ;;  %vm261_vm8 = vsmask.f32 2306  ;;  %v1055_v8 = vld [vmem:[%s1370_s1 + $0x10] sm:$0xff]   ;;  %v1056_v16 = vld [vmem:[%s1370_s1 + $0x28] sm:$0xff]   ;;  %vm233_vm11 = vcmask 516096   ;;  %p1081_p13 = pneg %p1080_p12 }
  0x17   : > { %226 = vst [vmem:[#allocation2] sm:$0x1] %v225_v5  ;;  %v231_v6 = vsel %vm229_vm6, 0, %v230_v4  ;;  %s865_s12 = sshll.u32 %s217_s9, 1  ;;  %960 = vmatpush3.bf16.msra.mxu1 %v1054_v7  ;;  %vm262_vm9 = vmand %vm260_vm7, %vm261_vm8  ;;  %v1058_v20 = vld [vmem:[%s1370_s1 + $0x20] sm:$0xff]   ;;  %vm238_vm12 = vcmask 518146   ;;  %s799_s9 = scalar_lea.hbm %s1374_s5, %s923_s26 }
  0x18   : > { %232 = vst [vmem:[#allocation2] sm:$0x4] %v231_v6  ;;  %s219_s15 = scalar_lea.vmem %s1369_s0, %s865_s12  ;;  %961 = vmatprep.subr.bf16.mxu1 %v1140_v1  ;;  %vm234_vm13 = vmand %vm233_vm11, %vm222_vm2  ;;  %v235_v26 = vld [vmem:[#allocation3] sm:$0x1]  ;;  %v240_v27 = vld [vmem:[#allocation3] sm:$0x4] }
  0x19   : > { %954 = vmatpush3.bf16.msra.mxu0 %v1053_v2  ;;  %v866_v9 = vld.sshfl [vmem:[%s219_s15] sm:$0x3 pattern:$0x76325410]  ;;  %vm239_vm14 = vmand %vm238_vm12, %vm228_vm5  ;;  %v1060_v28 = vld [vmem:[%s1372_s3 + $0x18] sm:$0xff]   ;;  %v236_v29 = vsel %vm234_vm13, 0, %v235_v26 }
  0x1a   : > { %967 = vmatprep.subr.bf16.mxu0 %v1140_v1  ;;  %v253_v10 = vshrl.u32 %v866_v9, 16  ;;  %v256_v11 = vshll.u32 %v866_v9, 16  ;;  %v241_v30 = vsel %vm239_vm14, 0, %v240_v27  ;;  %237 = vst [vmem:[#allocation3] sm:$0x1] %v236_v29  ;;  %v1061_v31 = vld [vmem:[%s1372_s3 + $0x10] sm:$0xff]  }
  0x1b   : > { %962 = vmatpush3.bf16.msra.mxu1 %v1055_v8  ;;  %242 = vst [vmem:[#allocation3] sm:$0x4] %v241_v30  ;;  %v1062_v32 = vld [vmem:[%s1372_s3 + $0x8] sm:$0xff]   ;;  %v1063_v33 = vld [vmem:[%s1372_s3 + $0x38] sm:$0xff]   ;;  %v1065_v34 = vld [vmem:[%s1372_s3 + $0x30] sm:$0xff]   ;;  %vm329_vm15 = vcmask 519168  }
  0x1c   : > { %v255_v12 = vrot.slane %v253_v10, 7  ;;  %975 = vmatprep.subr.bf16.mxu1 %v1140_v1  ;;  %v1064_v35 = vld [vmem:[%s1372_s3] sm:$0xff]   ;;  %v1067_v36 = vld [vmem:[%s1372_s3 + $0x28] sm:$0xff]   ;;  %vm520_vm2 = vcmask 518144   ;;  %vm558_vm4 = vcmask 523264   ;;  %v1066_v26 = vld [vmem:[%s1372_s3 + $0x58] sm:$0xff]  }
  0x1d   : > { %v1069_v37 = vld [vmem:[%s1372_s3 + $0x20] sm:$0xff]   ;;  %vm521_vm3 = vmand %vm520_vm2, %vm261_vm8  ;;  %v1068_v29 = vld [vmem:[%s1372_s3 + $0x50] sm:$0xff]   ;;  %s1142_s12 = smov [#allocation6]  }
  0x1e   : > { %v258_v13 = vor.u32 %v256_v11, %v255_v12  ;;  %v886_v54 = vld [vmem:[%s1371_s2] ss:$0 sm:$0xff]  ;;  %s1082_s13 = sshll.u32 %s1142_s12, 4  ;;  %s1083_s13 = int_to_ptr.vmem [resolvable:$false] %s1082_s13 }
  0x1f   : > { %v263_v14 = vld [vmem:[#allocation2] sm:$0x7]  ;;  %s1084_s22 = scalar_lea.vmem %s1083_s13, 128  ;;  %p1085_p0 = scmp.lt.s32.totalorder %s802_s6, %s1083_s13 }
  0x20   : > { %v264_v15 = vsel %vm262_vm9, %v258_v13, %v263_v14  ;;  %p1086_p1 = scmp.lt.s32.totalorder %s1084_s22, %s1078_s11 }
  0x21   : > { %265 = vst [vmem:[#allocation2] sm:$0x7] %v264_v15 }
  0x22   : > { %p1087_p2 = por %p1086_p1, %p1085_p0 }
  0x24   : > { %p1088_p3 = pnand %p1087_p2, %p1081_p13 }
  0x28   : > { %v268_v17 = vld [vmem:[#allocation2] sm:$0x3] }
  0x29   : > { %956 = vmatmul.mubr.msk.bf16.vlgmr.msra.gmra.mxu0 %vm285_vm10, %v268_v17  ;;  %v1057_v18 = vld [vmem:[#allocation2] ss:$0 sps:$4 sm:$0x77]  }
  0x2a   : > { %v1059_v19 = vld [vmem:[#allocation2] ss:$0 sps:$4 sm:$0x66]   ;;  %968 = vmatpush3.bf16.msra.mxu0 %v1056_v16  ;;  %971 = vmatprep.mubr.msk.bf16.mxu0 %vm1141_vm0, %v1140_v1  ;;  %v342_v21 = vshrl.u32 %v1057_v18, 16  ;;  %v344_v22 = vshll.u32 %v1057_v18, 16 }
  0x2b   : > { %969 = vmatprep.subr.bf16.mxu0 %v1140_v1  ;;  %v415_v24 = vrot.slane %v1059_v19, 1 }
  0x2c   : > { %v346_v23 = vrot.slane %v344_v22, 1 }
  0x2e   : > { %970 = vmatpush3.bf16.msra.mxu0 %v1058_v20  ;;  %v347_v25 = vor.u32 %v346_v23, %v342_v21  ;;  %v522_v23 = vld [vmem:[#allocation3] sm:$0x7] }
  0x2f   : > { %987 = vmatprep.subr.bf16.mxu0 %v1140_v1 }
  0x30   : > { %964 = vmatmul.mubr.msk.bf16.vlgmr.msra.gmra.mxu1 %vm285_vm10, %v347_v25 }
  0x31   : > { %972 = vmatmul.mubr.msk.bf16.vlgmr.msra.gmra.mxu0 %vm285_vm10, %v415_v24  ;;  %983 = vmatprep.mubr.msk.bf16.mxu1 %vm1141_vm0, %v1140_v1 }
  0x32   : > { %995 = vmatprep.mubr.msk.bf16.mxu0 %vm1141_vm0, %v1140_v1  ;;  %976 = vmatpush3.bf16.msra.mxu1 %v1060_v28 }
  0x33   : > { %977 = vmatprep.subr.bf16.mxu1 %v1140_v1  ;;  %988 = vmatpush3.bf16.msra.mxu0 %v1063_v33  ;;  %v1071_v33 = vld [vmem:[%s1372_s3 + $0x48] sm:$0xff]  }
  0x34   : > { %989 = vmatprep.subr.bf16.mxu0 %v1140_v1 }
  0x36   : > { %978 = vmatpush3.bf16.msra.mxu1 %v1061_v31 }
  0x37   : > { %979 = vmatprep.subr.bf16.mxu1 %v1140_v1  ;;  %990 = vmatpush3.bf16.msra.mxu0 %v1065_v34 }
  0x38   : > { %991 = vmatprep.subr.bf16.mxu0 %v1140_v1 }
  0x3a   : > { %980 = vmatpush3.bf16.msra.mxu1 %v1062_v32 }
  0x3b   : > { %981 = vmatprep.subr.bf16.mxu1 %v1140_v1  ;;  %992 = vmatpush3.bf16.msra.mxu0 %v1067_v36 }
  0x3c   : > { %993 = vmatprep.subr.bf16.mxu0 %v1140_v1 }
  0x3e   : > { %982 = vmatpush3.bf16.msra.mxu1 %v1064_v35  ;;  %v1072_v35 = vld [vmem:[%s1372_s3 + $0x40] sm:$0xff]  }
  0x3f   : > { %999 = vmatprep.subr.bf16.mxu1 %v1140_v1  ;;  %994 = vmatpush3.bf16.msra.mxu0 %v1069_v37 }
  0xe9   : > { %v323_v38 = vpop.f32.mrf.mxu0 }
  0xea   : > { %330 = vst.msk [vmem:[#allocation4] sm:$0xf] %vm329_vm15, %v323_v38 }
  0xeb   : > { %v957_v39 = vpop.f32.mrf.mxu0 }
  0xed   : > { %v326_v40 = vpop.f32.mrf.mxu0 }
  0xef   : > { %v958_v41 = vpop.f32.mrf.mxu0 }
  0xf0   : > { %v397_v43 = vpop.f32.mrf.mxu1 }
  0xf1   : > { %v331_v42 = vld [vmem:[#allocation4] sm:$0xf]  ;;  %v465_v44 = vpop.f32.mrf.mxu0 }
  0xf2   : > { %v403_v45 = vadd.f32 %v397_v43, %v331_v42  ;;  %v965_v46 = vpop.f32.mrf.mxu1 }
  0xf3   : > { %v973_v47 = vpop.f32.mrf.mxu0 }
  0xf4   : > { %404 = vst.msk [vmem:[#allocation4] sm:$0xf] %vm329_vm15, %v403_v45  ;;  %v400_v48 = vpop.f32.mrf.mxu1 }
  0xf5   : > { %v468_v49 = vpop.f32.mrf.mxu0 }
  0xf6   : > { %v966_v50 = vpop.f32.mrf.mxu1 }
  0xf7   : > { %v974_v51 = vpop.f32.mrf.mxu0 }
  0xfb   : > { %v405_v52 = vld [vmem:[#allocation4] sm:$0xf] }
  0xfc   : > { %v471_v53 = vadd.f32 %v465_v44, %v405_v52 }
  0xfe   : > { %472 = vst.msk [vmem:[#allocation4] sm:$0xf] %vm329_vm15, %v471_v53  ;;  %v921_v53 = vld [vmem:[%s1373_s4] ss:$0 sm:$0xff] }
 0x105   : > { %v473_v55 = vld [vmem:[#allocation4] sm:$0xf] }
 0x106   : > { %v480_v56 = vadd.f32 %v886_v54, %v473_v55 }
 0x108   : > { %v482_v57 = vmul.f32 0.70710677, %v480_v56  ;;  %v481_v16 = vmul.f32 0.5, %v480_v56 }
 0x10a   : > { %v483_v58 = vand.u32 2147483647, %v482_v57  ;;  %vm503_vm1 = vcmp.lt.f32.partialorder %v482_v57, 0.0 }
 0x10c   : > { %v484_v59 = vmul.f32 0.3275911, %v483_v58  ;;  %v497_v61 = vsub.f32 0.0, %v483_v58 }
 0x10e   : > { %v485_v60 = vadd.f32 1.0, %v484_v59  ;;  %v498_v62 = vmul.f32 %v497_v61, %v483_v58 }
 0x110   : > { %1074 = vrcp.f32 %v485_v60  ;;  %v499_v2 = vmul.f32 1.442695, %v498_v62 }
 0x112   : > { %1076 = vpow2.f32 %v499_v2 }
 0x11d   : > { %v1075_v63 = vpop.eup %1074 }
 0x11e   : > { %v488_v0 = vmul.f32 1.0614054, %v1075_v63 }
 0x11f   : > { %v1077_v11 = vpop.eup %1076 }
 0x120   : > { %v489_v3 = vadd.f32 -1.4531521, %v488_v0 }
 0x122   : > { %v490_v4 = vmul.f32 %v1075_v63, %v489_v3 }
 0x124   : > { %v491_v5 = vadd.f32 1.4214138, %v490_v4 }
 0x126   : > { %v492_v6 = vmul.f32 %v1075_v63, %v491_v5 }
 0x128   : > { %v493_v7 = vadd.f32 -0.28449672, %v492_v6 }
 0x12a   : > { %v494_v8 = vmul.f32 %v1075_v63, %v493_v7 }
 0x12c   : > { %v495_v9 = vadd.f32 0.2548296, %v494_v8 }
 0x12e   : > { %v496_v10 = vmul.f32 %v1075_v63, %v495_v9 }
 0x130   : > { %v501_v12 = vmul.f32 %v1077_v11, %v496_v10 }
 0x132   : > { %v502_v13 = vsub.f32 1.0, %v501_v12 }
 0x134   : > { %v504_v14 = vsub.f32 0.0, %v502_v13 }
 0x136   : > { %v505_v15 = vsel %vm503_vm1, %v504_v14, %v502_v13 }
 0x137   : > { %v506_v17 = vadd.f32 1.0, %v505_v15 }
 0x139   : > { %v507_v18 = vmul.f32 %v506_v17, %v481_v16 }
 0x13b   : > { %v926_v19 = vpack.c.bf16 %v507_v18, %v507_v18 }
 0x13d   : > { %v513_v20 = vshrl.u32 %v926_v19, 16  ;;  %v516_v22 = vshll.u32 %v926_v19, 16 }
 0x13f   : > { %v515_v21 = vrot.slane %v513_v20, 7 }
 0x141   : > { %v518_v24 = vor.u32 %v516_v22, %v515_v21 }
 0x143   : > { %v523_v25 = vsel %vm521_vm3, %v518_v24, %v522_v23 }
 0x144   : > { %524 = vst [vmem:[#allocation3] sm:$0x7] %v523_v25 }
 0x14b   : > { %v525_v27 = vld [vmem:[#allocation3] sm:$0x3] }
 0x14c   : > { %984 = vmatmul.mubr.msk.bf16.vlgmr.msra.gmra.mxu1 %vm558_vm4, %v525_v27  ;;  %v1070_v28 = vld [vmem:[#allocation3] ss:$0 sps:$4 sm:$0x77]  }
 0x14d   : > { %1000 = vmatpush3.bf16.msra.mxu1 %v1066_v26  ;;  %1007 = vmatprep.mubr.msk.bf16.mxu1 %vm1141_vm0, %v1140_v1  ;;  %v621_v30 = vshll.u32 %v1070_v28, 16  ;;  %v619_v31 = vshrl.u32 %v1070_v28, 16  ;;  %v1073_v36 = vld [vmem:[#allocation3] ss:$0 sps:$4 sm:$0x66]   ;;  %vm602_vm0 = vcmask 257024  }
 0x14e   : > { %1001 = vmatprep.subr.bf16.mxu1 %v1140_v1  ;;  %v708_v37 = vrot.slane %v1073_v36, 1 }
 0x14f   : > { %v623_v32 = vrot.slane %v621_v30, 1 }
 0x151   : > { %1002 = vmatpush3.bf16.msra.mxu1 %v1068_v29  ;;  %v624_v34 = vor.u32 %v623_v32, %v619_v31 }
 0x152   : > { %1003 = vmatprep.subr.bf16.mxu1 %v1140_v1 }
 0x153   : > { %996 = vmatmul.mubr.msk.bf16.vlgmr.msra.gmra.mxu0 %vm558_vm4, %v624_v34 }
 0x155   : > { %1004 = vmatpush3.bf16.msra.mxu1 %v1071_v33 }
 0x156   : > { %1005 = vmatprep.subr.bf16.mxu1 %v1140_v1 }
 0x159   : > { %1006 = vmatpush3.bf16.msra.mxu1 %v1072_v35 }
 0x15c   : > { %1008 = vmatmul.mubr.msk.bf16.vlgmr.msra.gmra.mxu1 %vm558_vm4, %v708_v37 }
 0x20c   : > { %v596_v38 = vpop.f32.mrf.mxu1 }
 0x20d   : > { %603 = vst.msk [vmem:[#allocation5] sm:$0xf] %vm602_vm0, %v596_v38 }
 0x20e   : > { %v985_v39 = vpop.f32.mrf.mxu1 }
 0x210   : > { %v599_v40 = vpop.f32.mrf.mxu1 }
 0x212   : > { %v986_v41 = vpop.f32.mrf.mxu1 }
 0x213   : > { %v686_v43 = vpop.f32.mrf.mxu0 }
 0x214   : > { %v604_v42 = vld [vmem:[#allocation5] sm:$0xf] }
 0x215   : > { %v692_v44 = vadd.f32 %v686_v43, %v604_v42  ;;  %v997_v45 = vpop.f32.mrf.mxu0 }
 0x217   : > { %693 = vst.msk [vmem:[#allocation5] sm:$0xf] %vm602_vm0, %v692_v44  ;;  %v689_v1 = vpop.f32.mrf.mxu0 }
 0x219   : > { %v998_v46 = vpop.f32.mrf.mxu0 }
 0x21c   : > { %v770_v47 = vpop.f32.mrf.mxu1 }
 0x21e   : > { %v694_v48 = vld [vmem:[#allocation5] sm:$0xf]  ;;  %v1009_v49 = vpop.f32.mrf.mxu1 }
 0x21f   : > { %v776_v50 = vadd.f32 %v770_v47, %v694_v48 }
 0x220   : > { %v773_v51 = vpop.f32.mrf.mxu1 }
 0x221   : > { %777 = vst.msk [vmem:[#allocation5] sm:$0xf] %vm602_vm0, %v776_v50 }
 0x222   : > { %v1010_v52 = vpop.f32.mrf.mxu1 }
 0x228   : > { %v778_v54 = vld [vmem:[#allocation5] sm:$0xf] }
 0x229   : > { %v785_v55 = vadd.f32 %v921_v53, %v778_v54 }
 0x22b   : > { %786 = vst.msk [vmem:[%s215_s30] sm:$0xf] %vm602_vm0, %v785_v55 }
 0x22c   : > { %1091 = shalt.err (!%p1088_p3)
}
 0x22d   : > { %s1092_s14 = scalar_lea.hbm %s799_s9, 64  ;;  %s1096_s17 = scalar_lea.hbm %s1374_s5, 128 }
 0x22e   : > { %p1093_p4 = scmp.ne.s32.totalorder %s799_s9, %s1092_s14  ;;  %p1097_p9 = scmp.lt.s32.totalorder %s799_s9, %s1374_s5 }
 0x22f   : > { %p1098_p10 = scmp.lt.s32.totalorder %s1096_s17, %s1092_s14 }
 0x230   : > { %p1094_p7 = pnand %p1093_p4, %p1211_p5 }
 0x231   : > { %p1099_p11 = por %p1098_p10, %p1097_p9 }
 0x232   : > { %p1095_p8 = pneg %p1094_p7 }
 0x234   : > { %p1100_p12 = pnand %p1099_p11, %p1095_p8 }
 0x236   : > { %1103 = shalt.err (!%p1100_p12)
}
 0x237   : > { %1011 = dma.vmem_to_hbm [thread:$0]  (%p1211_p5), %s802_s6, 64, %s799_s9, %s788_s10  }
 0x238 PF: > { %p1017_p13 = scmp.ge.s32.totalorder %s1138_s21, 2  ;;  %s813_s26 = sand.u32 1, %s1126_s18  }
 0x239   : > { %s814_s30 = scalar_lea.sflag [#allocation7], %s813_s26 }
 0x23a   : > { %p1014_p0 = pnand %p1017_p13, %p1215_p6 }
 0x23c   : > { %p1015_p1 = pneg %p1014_p0 }
 0x23e   : > { %1121 = dma.done.wait (%p1015_p1), %s814_s30, 64  }
 0x23f   : > { %1123 = vsyncadd (%p1015_p1), %s814_s30, 4294967232  ;;  %p15_p2 = scmp.ge.s32.totalorder %s1198_s24, 4   ;;  %s1377_s18 = smov %s1130_s19 }
 0x240   : > { %s1378_s19 = smov %s1134_s20  ;;  %s1379_s20 = smov %s1209_s27 }
 0x241   : > { %s1380_s21 = smov %s1198_s24  ;;  %17 = sbr.rel (!%p15_p2) target bundleno = 3 (0x3), region = 79 }
 0x246   :  { %819 = vsyncpa [#allocation7], 1 }
 0x247   :  { %821 = vsyncpa [#allocation7 + $0x1], 1 }

</bundles_post_ra>
